<compile_context>
chip_gen: v6e
topology: v6e:2x2x1
jax: 0.10.0
libtpu: 0.0.40
codegen_flags: <defaults>
</compile_context>

<pallas_src>
import jax
import jax.numpy as jnp
from jax import lax
from jax.experimental import pallas as pl
from jax.experimental.pallas import tpu as pltpu

DROPOUT_P = 0.2
HIDDEN_SIZE = 128
# keep element  <=>  rbits >= p * 2^32   (P(keep) = 1 - p)
_DROP_THRESHOLD_INT = int(round(DROPOUT_P * (1 << 32)))
_KEEP_SCALE = 1.0 / (1.0 - DROPOUT_P)


def sdpa_dropout_kernel(q_ref, k_ref, v_ref, scale_ref, rbits_ref, o_ref):
    # qk = query @ key^T : contract the last dims directly (no materialized
    # (D,S) transpose / XLU vxpose), bf16 operands, f32 MXU accumulation.
    qk = lax.dot_general(
        q_ref[...], k_ref[...],
        dimension_numbers=(((1,), (1,)), ((), ())),
        preferred_element_type=jnp.float32,
    )

    # scaled_qk = qk / inv_scale_factor  -> multiply by the pre-reciprocated
    # lane-major (1, S) scale (cheap sublane-broadcast direction).
    scaled = qk * scale_ref[...]

    # Numerically stable softmax over the last dim (elementwise math kept in f32),
    # with the 1/sum and 1/(1-p) scales fused into one per-row factor.
    m = jnp.max(scaled, axis=-1, keepdims=True)
    e = jnp.exp(scaled - m)
    denom = jnp.sum(e, axis=-1, keepdims=True)           # (S, 1)
    r = jnp.float32(_KEEP_SCALE) / denom                 # (S, 1)

    # Dropout via integer threshold on precomputed uniform uint32 bits.
    keep = rbits_ref[...] >= jnp.uint32(_DROP_THRESHOLD_INT)
    dropped = jnp.where(keep, e, 0.0) * r

    # output = dropout_qk @ value : bf16 MXU operands, f32 accumulation.
    o_ref[...] = jnp.dot(
        dropped.astype(jnp.bfloat16), v_ref[...],
        preferred_element_type=jnp.float32,
    ).astype(o_ref.dtype)


def model_forward(query, key, value, inv_scale_factor, qkv_w, *, rng_key=None):
    """Pallas implementation of Model.forward (scaled-dot-product + dropout)."""
    # TODO(synk): qkv_proj branch of the reference forward is unused dead code
    # (and references undefined self.n_heads); kept out of the hot-path kernel.
    del qkv_w

    S, D = query.shape
    Dv = value.shape[1]

    # One-time wrapper-side prep:
    #  * pre-reciprocated (1, S) column scale  (32 reciprocals instead of S*S divides)
    #  * uniform uint32 dropout bits (portable; no TPU-only PRNG primitives in-kernel)
    scale = (1.0 / inv_scale_factor.astype(jnp.float32)).reshape(1, S)
    if rng_key is None:
        rng_key = jax.random.PRNGKey(0)
    rbits = jax.random.bits(rng_key, (S, S), dtype=jnp.uint32)

    # bf16 MXU operands (f32 accumulation inside the kernel); also halves DMA bytes.
    q_bf = query.astype(jnp.bfloat16)
    k_bf = key.astype(jnp.bfloat16)
    v_bf = value.astype(jnp.bfloat16)

    grid_spec = pltpu.PrefetchScalarGridSpec(
        num_scalar_prefetch=0,
        grid=(1,),
        in_specs=[
            pl.BlockSpec((S, D), lambda i: (0, 0)),    # query (bf16)
            pl.BlockSpec((S, D), lambda i: (0, 0)),    # key   (bf16)
            pl.BlockSpec((S, Dv), lambda i: (0, 0)),   # value (bf16)
            pl.BlockSpec((1, S), lambda i: (0, 0)),    # 1/inv_scale_factor
            pl.BlockSpec((S, S), lambda i: (0, 0)),    # dropout bits (uint32)
        ],
        out_specs=pl.BlockSpec((S, Dv), lambda i: (0, 0)),
    )

    return pl.pallas_call(
        sdpa_dropout_kernel,
        out_shape=jax.ShapeDtypeStruct((S, Dv), jnp.float32),
        grid_spec=grid_spec,
        compiler_params=pltpu.CompilerParams(
            dimension_semantics=("arbitrary",)
        ),
    )(q_bf, k_bf, v_bf, scale, rbits)


if __name__ == "__main__":
    root = jax.random.PRNGKey(0)
    k1, k2, k3, k4, k5 = jax.random.split(root, 5)

    S = 32            # sequence length (matches inv_scale_factor = ones((32,)))
    D = HIDDEN_SIZE   # 128, matches hidden_size / query feature dim
    Dv = 256          # value feature dim, matches value = randn(32, 256)

    query = jax.random.normal(k1, (S, D), dtype=jnp.float32)
    key = jax.random.normal(k2, (S, D), dtype=jnp.float32)
    value = jax.random.normal(k3, (S, Dv), dtype=jnp.float32)
    inv_scale_factor = jnp.ones((S,), dtype=jnp.float32)

    # Deterministic init of the (dead-code) qkv_proj weight: Linear(hidden, 2*hidden, bias=False)
    qkv_w = jax.random.normal(k4, (2 * HIDDEN_SIZE, HIDDEN_SIZE), dtype=jnp.float32) * 0.02

    out = model_forward(query, key, value, inv_scale_factor, qkv_w, rng_key=k5)
    out = jax.block_until_ready(out)
    assert out.shape == (S, Dv)
    assert bool(jnp.all(jnp.isfinite(out)))
    print("KERNEL_OK")
</pallas_src>

<mosaic_0001>
module attributes {stable_mosaic.version = 11 : i64} {
  func.func @sdpa_dropout_kernel(%arg0: i32, %arg1: memref<32x128xbf16, #tpu.memory_space<vmem>>, %arg2: memref<32x128xbf16, #tpu.memory_space<vmem>>, %arg3: memref<32x256xbf16, #tpu.memory_space<vmem>>, %arg4: memref<1x32xf32, #tpu.memory_space<vmem>>, %arg5: memref<32x32xi32, #tpu.memory_space<vmem>>, %arg6: memref<32x256xf32, #tpu.memory_space<vmem>>) attributes {dimension_semantics = [#tpu.dimension_semantics<arbitrary>], iteration_bounds = array<i64: 1>, scalar_prefetch = 0 : i64, scratch_operands = 0 : i64, tpu.core_type = #tpu.core_type<tc>, window_params = [{pipeline_mode = #tpu.pipeline_mode<synchronous>, transform_indices = @transform_0, window_bounds = array<i64: 32, 128>}, {pipeline_mode = #tpu.pipeline_mode<synchronous>, transform_indices = @transform_1, window_bounds = array<i64: 32, 128>}, {pipeline_mode = #tpu.pipeline_mode<synchronous>, transform_indices = @transform_2, window_bounds = array<i64: 32, 256>}, {pipeline_mode = #tpu.pipeline_mode<synchronous>, transform_indices = @transform_3, window_bounds = array<i64: 1, 32>}, {pipeline_mode = #tpu.pipeline_mode<synchronous>, transform_indices = @transform_4, window_bounds = array<i64: 32, 32>}, {pipeline_mode = #tpu.pipeline_mode<synchronous>, transform_indices = @transform_5, window_bounds = array<i64: 32, 256>}]} {
    %c0 = arith.constant 0 : index
    %c0_0 = arith.constant 0 : index
    %0 = vector.load %arg1[%c0, %c0_0] : memref<32x128xbf16, #tpu.memory_space<vmem>>, vector<32x128xbf16>
    %c0_1 = arith.constant 0 : index
    %c0_2 = arith.constant 0 : index
    %1 = vector.load %arg2[%c0_1, %c0_2] : memref<32x128xbf16, #tpu.memory_space<vmem>>, vector<32x128xbf16>
    %cst = arith.constant dense<0.000000e+00> : vector<32x32xf32>
    %2 = tpu.matmul %0, %1, %cst {dimension_numbers = #tpu.dot_dimension_numbers<[1], [1], [0], [0], [0, 0, 1, 0], [], []>} : vector<32x128xbf16>, vector<32x128xbf16>, vector<32x32xf32> -> vector<32x32xf32>
    %c0_3 = arith.constant 0 : index
    %c0_4 = arith.constant 0 : index
    %3 = vector.load %arg4[%c0_3, %c0_4] : memref<1x32xf32, #tpu.memory_space<vmem>>, vector<1x32xf32>
    %4 = vector.broadcast %3 : vector<1x32xf32> to vector<32x32xf32>
    %5 = arith.mulf %2, %4 : vector<32x32xf32>
    %cst_5 = arith.constant dense<0xFF800000> : vector<32xf32>
    %6 = vector.multi_reduction <maximumf>, %5, %cst_5 [1] : vector<32x32xf32> to vector<32xf32>
    %7 = vector.shape_cast %6 : vector<32xf32> to vector<32x1xf32>
    %8 = vector.broadcast %7 : vector<32x1xf32> to vector<32x32xf32>
    %9 = arith.subf %5, %8 : vector<32x32xf32>
    %10 = math.exp %9 : vector<32x32xf32>
    %cst_6 = arith.constant dense<0.000000e+00> : vector<32xf32>
    %11 = vector.multi_reduction <add>, %10, %cst_6 [1] : vector<32x32xf32> to vector<32xf32>
    %12 = vector.shape_cast %11 : vector<32xf32> to vector<32x1xf32>
    %cst_7 = arith.constant 1.250000e+00 : f32
    %13 = vector.broadcast %cst_7 : f32 to vector<32x1xf32>
    %14 = arith.divf %13, %12 : vector<32x1xf32>
    %c0_8 = arith.constant 0 : index
    %c0_9 = arith.constant 0 : index
    %15 = vector.load %arg5[%c0_8, %c0_9] : memref<32x32xi32, #tpu.memory_space<vmem>>, vector<32x32xi32>
    %c858993459_i32 = arith.constant 858993459 : i32
    %16 = vector.broadcast %c858993459_i32 : i32 to vector<32x32xi32>
    %17 = arith.cmpi uge, %15, %16 : vector<32x32xi32>
    %cst_10 = arith.constant 0.000000e+00 : f32
    %18 = vector.broadcast %cst_10 : f32 to vector<32x32xf32>
    %19 = arith.select %17, %10, %18 : vector<32x32xi1>, vector<32x32xf32>
    %20 = vector.broadcast %14 : vector<32x1xf32> to vector<32x32xf32>
    %21 = arith.mulf %19, %20 : vector<32x32xf32>
    %22 = arith.truncf %21 : vector<32x32xf32> to vector<32x32xbf16>
    %c0_11 = arith.constant 0 : index
    %c0_12 = arith.constant 0 : index
    %23 = vector.load %arg3[%c0_11, %c0_12] : memref<32x256xbf16, #tpu.memory_space<vmem>>, vector<32x256xbf16>
    %cst_13 = arith.constant dense<0.000000e+00> : vector<32x256xf32>
    %24 = tpu.matmul %22, %23, %cst_13 {dimension_numbers = #tpu.dot_dimension_numbers<[1], [0], [0], [1], [0, 0, 1, 1], [], []>} : vector<32x32xbf16>, vector<32x256xbf16>, vector<32x256xf32> -> vector<32x256xf32>
    %c0_14 = arith.constant 0 : index
    %c0_15 = arith.constant 0 : index
    %25 = vector.load %arg6[%c0_14, %c0_15] : memref<32x256xf32, #tpu.memory_space<vmem>>, vector<32x256xf32>
    tpu.vector_store %arg6[%c0_14, %c0_15], %24 {strides = array<i32>} : memref<32x256xf32, #tpu.memory_space<vmem>>, vector<32x256xf32>,
    return
  }
  func.func @transform_0(%arg0: i32) -> (i32, i32) {
    %c0_i32 = arith.constant 0 : i32
    %c0_i32_0 = arith.constant 0 : i32
    %c0_i32_1 = arith.constant 0 : i32
    return %c0_i32, %c0_i32_0 : i32, i32
  }
  func.func @transform_1(%arg0: i32) -> (i32, i32) {
    %c0_i32 = arith.constant 0 : i32
    %c0_i32_0 = arith.constant 0 : i32
    %c0_i32_1 = arith.constant 0 : i32
    return %c0_i32, %c0_i32_0 : i32, i32
  }
  func.func @transform_2(%arg0: i32) -> (i32, i32) {
    %c0_i32 = arith.constant 0 : i32
    %c0_i32_0 = arith.constant 0 : i32
    %c0_i32_1 = arith.constant 0 : i32
    return %c0_i32, %c0_i32_0 : i32, i32
  }
  func.func @transform_3(%arg0: i32) -> (i32, i32) {
    %c0_i32 = arith.constant 0 : i32
    %c0_i32_0 = arith.constant 0 : i32
    %c0_i32_1 = arith.constant 0 : i32
    return %c0_i32, %c0_i32_0 : i32, i32
  }
  func.func @transform_4(%arg0: i32) -> (i32, i32) {
    %c0_i32 = arith.constant 0 : i32
    %c0_i32_0 = arith.constant 0 : i32
    %c0_i32_1 = arith.constant 0 : i32
    return %c0_i32, %c0_i32_0 : i32, i32
  }
  func.func @transform_5(%arg0: i32) -> (i32, i32) {
    %c0_i32 = arith.constant 0 : i32
    %c0_i32_0 = arith.constant 0 : i32
    %c0_i32_1 = arith.constant 0 : i32
    return %c0_i32, %c0_i32_0 : i32, i32
  }
}

</mosaic_0001>

<bundles_post_ra>
// kernel: tpu_custom_call.1
= control target key start
LH: loop header
LB: loop body
LE: loop exit
PB: predicated region body
PF: predicated region fallthrough
CT: control target
= control target key end

     0   :  { %10 = vsyncpa [#allocation3], 0  ;;  %s581_s0 = inlined_call_operand.hbm [shape: bf16[32,128], index: 0, kind: input, shape index: {}]   ;;  %s582_s1 = inlined_call_operand.hbm [shape: bf16[32,128], index: 1, kind: input, shape index: {}]   ;;  %s583_s2 = inlined_call_operand.hbm [shape: bf16[32,256], index: 2, kind: input, shape index: {}]   ;;  %s584_s3 = inlined_call_operand.vmem [shape: f32[1,32], index: 3, kind: input, shape index: {}]   ;;  %s585_s4 = inlined_call_operand.hbm [shape: u32[32,32], index: 4, kind: input, shape index: {}]   ;;  %s586_s5 = inlined_call_operand.hbm [shape: f32[32,256], index: 5, kind: output, shape index: {}]  }
   0x1   :  { %11 = vsyncpa [#allocation6], 0 }
   0x2   :  { %12 = vsyncpa [#allocation9], 0 }
   0x3   :  { %13 = vsyncpa [#allocation4], 0  ;;  %s511_s18 = smov [#allocation5]   ;;  %s512_s20 = smov [#allocation2]  }
   0x4   :  { %s31_s19 = sshll.u32 %s511_s18, 4  ;;  %s19_s21 = sshll.u32 %s512_s20, 4  ;;  %s32_s19 = int_to_ptr.vmem [resolvable:$true] %s31_s19  ;;  %s20_s21 = int_to_ptr.vmem [resolvable:$true] %s19_s21 }
   0x5   :  { %s411_s22 = scalar_lea.vmem %s32_s19, 256  ;;  %p416_p1 = scmp.lt.s32.totalorder %s32_s19, %s32_s19 }
   0x6   :  { %p412_p0 = scmp.ne.s32.totalorder %s32_s19, %s411_s22  ;;  %p417_p2 = scmp.lt.s32.totalorder %s411_s22, %s411_s22 }
   0x8   :  { %p418_p3 = por %p417_p2, %p416_p1 }
   0xa   :  { %p419_p4 = pnand %p418_p3, %p412_p0 }
   0xc   :  { %422 = shalt.err (!%p419_p4)
}
   0xd   :  { %s513_s23 = smov 64   ;;  %s514_s24 = smov 4  }
   0xe   :  { %37 = dma.hbm_to_vmem [thread:$0]  %s582_s1, 256, %s32_s19, [#allocation6], %s513_s23, %s513_s23, %s514_s24  }
   0xf   :  { %s431_s27 = scalar_lea.vmem %s20_s21, 256  ;;  %p436_p6 = scmp.lt.s32.totalorder %s20_s21, %s20_s21 }
  0x10   :  { %p432_p5 = scmp.ne.s32.totalorder %s20_s21, %s431_s27  ;;  %p437_p7 = scmp.lt.s32.totalorder %s431_s27, %s431_s27 }
  0x12   :  { %p438_p8 = por %p437_p7, %p436_p6 }
  0x14   :  { %p439_p9 = pnand %p438_p8, %p432_p5 }
  0x16   :  { %442 = shalt.err (!%p439_p9)
}
  0x17   :  { %25 = dma.hbm_to_vmem [thread:$0]  %s581_s0, 256, %s20_s21, [#allocation3], %s513_s23, %s513_s23, %s514_s24  }
  0x18   :  { %s515_s30 = smov [#allocation7]  }
  0x19   :  { %s43_s6 = sshll.u32 %s515_s30, 4  ;;  %s44_s6 = int_to_ptr.vmem [resolvable:$true] %s43_s6 }
  0x1a   :  { %s451_s7 = scalar_lea.vmem %s44_s6, 512  ;;  %p456_p11 = scmp.lt.s32.totalorder %s44_s6, %s44_s6 }
  0x1b   :  { %p452_p10 = scmp.ne.s32.totalorder %s44_s6, %s451_s7  ;;  %p457_p12 = scmp.lt.s32.totalorder %s451_s7, %s451_s7 }
  0x1d   :  { %p458_p13 = por %p457_p12, %p456_p11 }
  0x1f   :  { %p459_p0 = pnand %p458_p13, %p452_p10 }
  0x21   :  { %462 = shalt.err (!%p459_p0)
}
  0x22   :  { %s516_s1 = smov 128   ;;  %s517_s8 = smov 8  }
  0x23   :  { %49 = dma.hbm_to_vmem [thread:$0]  %s583_s2, 512, %s44_s6, [#allocation6], %s516_s1, %s516_s1, %s517_s8  }
  0x24   :  { %s518_s11 = smov [#allocation8]  }
  0x25   :  { %s57_s12 = sshll.u32 %s518_s11, 4  ;;  %s58_s12 = int_to_ptr.vmem [resolvable:$true] %s57_s12 }
  0x26   :  { %s471_s0 = scalar_lea.vmem %s58_s12, 512  ;;  %p476_p2 = scmp.lt.s32.totalorder %s58_s12, %s58_s12 }
  0x27   :  { %p472_p1 = scmp.ne.s32.totalorder %s58_s12, %s471_s0  ;;  %p477_p3 = scmp.lt.s32.totalorder %s471_s0, %s471_s0 }
  0x29   :  { %p478_p4 = por %p477_p3, %p476_p2 }
  0x2b   :  { %p479_p5 = pnand %p478_p4, %p472_p1 }
  0x2d   :  { %482 = shalt.err (!%p479_p5)
}
  0x2e   :  { %63 = dma.hbm_to_vmem [thread:$0]  %s585_s4, 512, %s58_s12, [#allocation9], %s516_s1, %s516_s1, %s517_s8  }
  0x2f   :  { %503 = dma.done.wait [#allocation3], 256  }
  0x30   :  { %504 = vsyncadd [#allocation3], 4294967040 }
  0x31   :  { %505 = dma.done.wait [#allocation6], 768  }
  0x32   :  { %506 = vsyncadd [#allocation6], 4294966528 }
  0x33   :  { %507 = dma.done.wait [#allocation9], 512  }
  0x34   :  { %508 = vsyncadd [#allocation9], 4294966784  ;;  %v377_v0 = vld [vmem:[#allocation5 + $0x8] sm:$0xff]   ;;  %v378_v1 = vld [vmem:[#allocation5] sm:$0xff]   ;;  %vm169_vm0 = vcmask 261120   ;;  %v519_v41 = vmov 0  }
  0x35   :  { %357 = vmatprep.subr.bf16.mxu0 %v377_v0  ;;  %v379_v2 = vld [vmem:[#allocation2] sm:$0xff]   ;;  %v380_v3 = vld [vmem:[#allocation2 + $0x8] sm:$0xff]   ;;  %v381_v37 = vld [vmem:[#allocation7 + $0x14] ss:$8 sps:$4 sm:$0xff]   ;;  %294 = vmatprep.mubr.bf16.mxu1 %v519_v41 }
  0x36   :  { %358 = vmatpush3.bf16.xpose.msra.mxu0 %v377_v0  ;;  %361 = vmatprep.mubr.bf16.mxu0 %v379_v2  ;;  %v346_v4 = vld [vmem:[%s584_s3] ss:$0 sm:$0xff]  ;;  %v383_v38 = vld [vmem:[#allocation7 + $0x10] ss:$8 sps:$4 sm:$0xff]   ;;  %v384_v39 = vld [vmem:[#allocation7 + $0x4] ss:$8 sps:$4 sm:$0xff]  }
  0x37   :  { %359 = vmatprep.subr.bf16.mxu0 %v378_v1  ;;  %274 = vmatprep.subr.bf16.mxu1 %v381_v37  ;;  %v386_v40 = vld [vmem:[#allocation7] ss:$8 sps:$4 sm:$0xff]   ;;  %v216_v50 = vld [vmem:[#allocation8 + $0x10] sm:$0xff]  ;;  %v217_v52 = vld [vmem:[#allocation8 + $0x18] sm:$0xff]  ;;  %s520_s3 = smov [#allocation10]  }
  0x38   :  { %275 = vmatpush1.bf16.msra.mxu1 %v383_v38  ;;  %v214_v47 = vld [vmem:[#allocation8] sm:$0xff]  ;;  %v215_v48 = vld [vmem:[#allocation8 + $0x8] sm:$0xff]  ;;  %vm220_vm3 = vcmp.ge.u32.totalorder %v216_v50, 858993459  ;;  %vm221_vm4 = vcmp.ge.u32.totalorder %v217_v52, 858993459 }
  0x39   :  { %276 = vmatprep.subr.bf16.mxu1 %v384_v39  ;;  %vm218_vm1 = vcmp.ge.u32.totalorder %v214_v47, 858993459  ;;  %vm219_vm2 = vcmp.ge.u32.totalorder %v215_v48, 858993459  ;;  %s328_s4 = sshll.u32 %s520_s3, 4  ;;  %s329_s4 = int_to_ptr.vmem [resolvable:$true] %s328_s4 }
  0x3a   :  { %s483_s16 = scalar_lea.vmem %s329_s4, 1024  ;;  %p488_p7 = scmp.lt.s32.totalorder %s329_s4, %s329_s4 }
  0x3b   :  { %p484_p6 = scmp.ne.s32.totalorder %s329_s4, %s483_s16  ;;  %p489_p8 = scmp.lt.s32.totalorder %s483_s16, %s483_s16 }
  0x3c   :  { %277 = vmatpush1.bf16.msra.mxu1 %v386_v40 }
  0x3d   :  { %p490_p9 = por %p489_p8, %p488_p7 }
  0x3e   :  { %360 = vmatpush3.bf16.xpose.msra.mxu0 %v378_v1 }
  0x3f   :  { %p491_p10 = pnand %p490_p9, %p484_p6 }
  0x45   :  { %362 = vmatmul.mubr.bf16.vlgmr.msra.gmra.mxu0 %v380_v3 }
 0x105   :  { %v363_v5 = vpop.f32.mrf.mxu0 }
 0x106   :  { %v167_v6 = vmul.f32 %v363_v5, %v346_v4 }
 0x107   :  { %v143_v7 = vpop.f32.mrf.mxu0 }
 0x108   :  { %v165_v8 = vmul.f32 %v346_v4, %v143_v7  ;;  %v176_v9 = vsel %vm169_vm0, %v167_v6, -inf }
 0x109   :  { %177 = vmax.xlane.f32.xlu1 %v176_v9  ;;  %v364_v10 = vpop.f32.mrf.mxu0 }
 0x10a   :  { %v168_v11 = vmul.f32 %v364_v10, %v346_v4  ;;  %v170_v12 = vsel %vm169_vm0, %v165_v8, -inf }
 0x10b   :  { %171 = vmax.xlane.f32.xlu0 %v170_v12  ;;  %v146_v13 = vpop.f32.mrf.mxu0 }
 0x10c   :  { %v166_v14 = vmul.f32 %v346_v4, %v146_v13  ;;  %v179_v15 = vsel %vm169_vm0, %v168_v11, -inf }
 0x10d   :  { %180 = vmax.xlane.f32.xlu1 %v179_v15 }
 0x10e   :  { %v173_v16 = vsel %vm169_vm0, %v166_v14, -inf }
 0x10f   :  { %174 = vmax.xlane.f32.xlu0 %v173_v16 }
 0x192   :  { %v178_v17 = vpop.xlane.xlu1 %177 }
 0x193   :  { %v184_v18 = vsub.f32 %v167_v6, %v178_v17 }
 0x194   :  { %v172_v19 = vpop.xlane.xlu0 %171 }
 0x195   :  { %v182_v20 = vsub.f32 %v165_v8, %v172_v19  ;;  %v190_v22 = vmul.f32 1.442695, %v184_v18 }
 0x196   :  { %v181_v21 = vpop.xlane.xlu1 %180 }
 0x197   :  { %v186_v23 = vmul.f32 1.442695, %v182_v20  ;;  %v185_v24 = vsub.f32 %v168_v11, %v181_v21 }
 0x198   :  { %v175_v25 = vpop.xlane.xlu0 %174 }
 0x199   :  { %387 = vpow2.f32 %v186_v23  ;;  %v183_v26 = vsub.f32 %v166_v14, %v175_v25  ;;  %v192_v27 = vmul.f32 1.442695, %v185_v24 }
 0x19a   :  { %389 = vpow2.f32 %v190_v22 }
 0x19b   :  { %v188_v28 = vmul.f32 1.442695, %v183_v26 }
 0x19d   :  { %391 = vpow2.f32 %v188_v28 }
 0x19e   :  { %393 = vpow2.f32 %v192_v27 }
 0x1a6   :  { %v388_v29 = vpop.eup %387 }
 0x1a7   :  { %v194_v30 = vsel %vm169_vm0, %v388_v29, 0.0  ;;  %v390_v31 = vpop.eup %389  ;;  %v222_v55 = vsel %vm218_vm1, %v388_v29, 0.0 }
 0x1a8   :  { %195 = vadd.xlane.f32.xlu0 %v194_v30  ;;  %v200_v33 = vsel %vm169_vm0, %v390_v31, 0.0  ;;  %v224_v63 = vsel %vm220_vm3, %v390_v31, 0.0 }
 0x1aa   :  { %v392_v32 = vpop.eup %391 }
 0x1ab   :  { %v197_v34 = vsel %vm169_vm0, %v392_v32, 0.0  ;;  %v394_v35 = vpop.eup %393  ;;  %v223_v56 = vsel %vm219_vm2, %v392_v32, 0.0 }
 0x1ac   :  { %201 = vadd.xlane.f32.xlu0 %v200_v33  ;;  %198 = vadd.xlane.f32.xlu1 %v197_v34  ;;  %v203_v36 = vsel %vm169_vm0, %v394_v35, 0.0  ;;  %v225_v0 = vsel %vm221_vm4, %v394_v35, 0.0 }
 0x1b0   :  { %204 = vadd.xlane.f32.xlu1 %v203_v36 }
 0x231   :  { %v196_v42 = vpop.xlane.xlu0 %195 }
 0x232   :  { %395 = vrcp.f32 %v196_v42 }
 0x235   :  { %v199_v43 = vpop.xlane.xlu1 %198  ;;  %v202_v44 = vpop.xlane.xlu0 %201 }
 0x236   :  { %397 = vrcp.f32 %v199_v43 }
 0x237   :  { %399 = vrcp.f32 %v202_v44 }
 0x239   :  { %v205_v45 = vpop.xlane.xlu1 %204 }
 0x23a   :  { %401 = vrcp.f32 %v205_v45 }
 0x23f   :  { %v396_v46 = vpop.eup %395 }
 0x240   :  { %v207_v49 = vmul.f32 1.25, %v396_v46 }
 0x242   :  { %v226_v57 = vmul.f32 %v222_v55, %v207_v49 }
 0x243   :  { %v398_v51 = vpop.eup %397 }
 0x244   :  { %v400_v53 = vpop.eup %399  ;;  %v209_v54 = vmul.f32 1.25, %v398_v51 }
 0x245   :  { %v211_v59 = vmul.f32 1.25, %v400_v53 }
 0x246   :  { %v227_v58 = vmul.f32 %v223_v56, %v209_v54 }
 0x247   :  { %v402_v60 = vpop.eup %401  ;;  %v228_v1 = vmul.f32 %v224_v63, %v211_v59 }
 0x248   :  { %v213_v61 = vmul.f32 1.25, %v402_v60  ;;  %v230_v62 = vpack.c.bf16 %v227_v58, %v226_v57 }
 0x24a   :  { %v229_v2 = vmul.f32 %v225_v0, %v213_v61  ;;  %351 = vmatmul.mubr.msk.bf16.vlgmr.msra.gmra.mxu1 %vm169_vm0, %v230_v62 }
 0x24b   :  { %304 = vmatprep.mubr.bf16.mxu1 %v519_v41 }
 0x24c   :  { %v231_v3 = vpack.c.bf16 %v229_v2, %v228_v1 }
 0x252   :  { %352 = vmatmul.mubr.msk.bf16.gmra.mxu1 %vm169_vm0, %v231_v3 }
 0x30a   :  { %v296_v4 = vpop.f32.mrf.mxu1 }
 0x30b   :  { %315 = vst [vmem:[#allocation10] sm:$0xff] %v296_v4 }
 0x30c   :  { %v298_v5 = vpop.f32.mrf.mxu1 }
 0x30d   :  { %316 = vst [vmem:[#allocation10 + $0x8] sm:$0xff] %v298_v5 }
 0x30e   :  { %v300_v6 = vpop.f32.mrf.mxu1 }
 0x30f   :  { %317 = vst [vmem:[#allocation10 + $0x10] sm:$0xff] %v300_v6 }
 0x310   :  { %v302_v7 = vpop.f32.mrf.mxu1 }
 0x311   :  { %318 = vst [vmem:[#allocation10 + $0x18] sm:$0xff] %v302_v7 }
 0x312   :  { %v306_v8 = vpop.f32.mrf.mxu1 }
 0x313   :  { %319 = vst [vmem:[#allocation10 + $0x20] sm:$0xff] %v306_v8 }
 0x314   :  { %v308_v9 = vpop.f32.mrf.mxu1 }
 0x315   :  { %320 = vst [vmem:[#allocation10 + $0x28] sm:$0xff] %v308_v9 }
 0x316   :  { %v310_v10 = vpop.f32.mrf.mxu1 }
 0x317   :  { %321 = vst [vmem:[#allocation10 + $0x30] sm:$0xff] %v310_v10 }
 0x318   :  { %v312_v11 = vpop.f32.mrf.mxu1 }
 0x319   :  { %322 = vst [vmem:[#allocation10 + $0x38] sm:$0xff] %v312_v11 }
 0x31a   :  { %494 = shalt.err (!%p491_p10)
}
 0x31b   :  { %s521_s17 = smov 256   ;;  %s522_s18 = smov 16  }
 0x31c   :  { %334 = dma.vmem_to_hbm [thread:$0]  %s329_s4, 1024, %s586_s5, [#allocation4], %s521_s17, %s521_s17, %s522_s18  }
 0x31d   :  { %509 = dma.done.wait [#allocation4], 1024  }
 0x31e   :  { %510 = vsyncadd [#allocation4], 4294966272 }
 0x31f   :  { %338 = vsyncpa [#allocation3], 1 }
 0x320   :  { %339 = vsyncpa [#allocation6], 1 }
 0x321   :  { %340 = vsyncpa [#allocation9], 1 }
 0x322   :  { %341 = vsyncpa [#allocation4], 1 }

</bundles_post_ra>
